<compile_context>
chip_gen: v7x
topology: tpu7x:2x2x1
jax: 0.10.0
libtpu: 0.0.40
codegen_flags: <defaults>
</compile_context>

<pallas_src>
import functools

import numpy as np
import jax
import jax.numpy as jnp
from jax import lax
from jax.experimental import pallas as pl
from jax.experimental.pallas import tpu as pltpu


def _round_up(x: int, m: int) -> int:
    return ((x + m - 1) // m) * m


def _gauss_expand_kernel(r_ref, o_ref, *, mu_min: float, delta: float,
                         neg_half_inv_sig2: float, out_dtype):
    """Gaussian expansion of one tile of distances.

    r_ref : (1, tile)     f32 — distances, M on lanes (lane-dense input stream)
    o_ref : (tile, n_mu)  out — final layout: M on sublanes, basis index on lanes
    """
    n_mu = o_ref.shape[1]
    tile = r_ref.shape[1]
    kpad = _round_up(n_mu, 8)                 # pad basis axis to a full sublane group

    r = r_ref[...]                                                  # (1, tile)
    # mu_k = mu_min + k*delta generated on sublanes from an iota: no extra input
    # DMA stream, no relayout of r before the (cheap) lane-dense math.
    k = lax.broadcasted_iota(jnp.int32, (kpad, tile), 0).astype(jnp.float32)
    mu = mu_min + k * delta                                         # (kpad, tile)
    d = r - mu                                                      # sublane-broadcast of r
    e = jnp.exp(neg_half_inv_sig2 * d * d)                          # EUP exp, f32

    # Single in-kernel relayout (XLU transpose, aligned (8k,128k) shapes): M moves
    # from lanes to sublanes so the store/writeback matches the (..., n_mu) output
    # layout directly — no post-kernel XLA transpose pass.
    t = jnp.transpose(e)                                            # (tile, kpad)
    o_ref[...] = t[:, :n_mu].astype(out_dtype)


def gaussian_expansion(r: jax.Array,
                       mu_min: float,
                       mu_max: float,
                       step: float,
                       sigma: float | None = None,
                       *,
                       max_tile: int = 4096,
                       out_dtype=jnp.float32) -> jax.Array:
    """Pallas-backed GaussianExpansion.forward.

    r: distances of any rank (typically (B, N) or (N,)). Returns r.shape + (n_mu,),
    with the leading axis squeezed iff it is size 1 (matching torch's .squeeze(0)).
    """
    if sigma is None:
        sigma = step
    n_mu = int(np.ceil((mu_max - mu_min) / step) + 1)
    delta = float(mu_max - mu_min) / float(max(n_mu - 1, 1))

    r = jnp.asarray(r, jnp.float32)
    orig_shape = r.shape
    M = int(np.prod(orig_shape))

    # Lane tiling of the flattened distance axis: tiles are multiples of 128 so the
    # kernel sees full lane groups (unmasked loads, aligned transpose shapes).
    m128 = _round_up(M, 128)
    tile = min(int(max_tile), m128)
    num_tiles = pl.cdiv(m128, tile)
    if num_tiles == 1 and m128 >= 1024:
        # Keep >=2 independent "parallel" steps so v7x's two TensorCores get work.
        num_tiles = 2
        tile = _round_up(pl.cdiv(m128, 2), 128)
    m_pad = tile * num_tiles

    r_flat = r.reshape(1, M)                       # lane-dense, cheap (4 B/elem)
    if m_pad != M:
        r_flat = jnp.pad(r_flat, ((0, 0), (0, m_pad - M)))

    out_full = pl.pallas_call(
        functools.partial(_gauss_expand_kernel,
                          mu_min=float(mu_min), delta=delta,
                          neg_half_inv_sig2=float(-0.5 / (float(sigma) ** 2)),
                          out_dtype=out_dtype),
        out_shape=jax.ShapeDtypeStruct((m_pad, n_mu), out_dtype),
        grid=(num_tiles,),
        in_specs=[pl.BlockSpec((1, tile), lambda i: (0, i))],
        out_specs=pl.BlockSpec((tile, n_mu), lambda i: (i, 0)),
        compiler_params=pltpu.CompilerParams(
            dimension_semantics=("parallel",),
            vmem_limit_bytes=32 * 1024 * 1024),
    )(r_flat)

    # Drop padded tail rows (only when M is ragged w.r.t. the tile) and restore the
    # module's output shape; the reshape is a metadata-only relayout for the common
    # aligned case.
    out = out_full[:M] if m_pad != M else out_full
    if r.ndim >= 2:
        out = out.reshape(orig_shape + (n_mu,))
        if orig_shape[0] == 1:
            out = out[0]                           # torch .squeeze(0)
    else:
        out = out.reshape(M, n_mu)                 # 1-D r: broadcast adds+drops axis 0
    return out


def _reference(r, mu_min, mu_max, step, sigma=None):
    """Pure-JAX reference mirroring the PyTorch code exactly."""
    if sigma is None:
        sigma = step
    n_mu = int(np.ceil((mu_max - mu_min) / step) + 1)
    mu = jnp.linspace(mu_min, mu_max, n_mu, dtype=jnp.float32).reshape(1, 1, -1)
    d = jnp.asarray(r, jnp.float32)[..., None]
    ged = jnp.exp(-0.5 * ((d - mu) / sigma) ** 2)
    return ged[0] if ged.shape[0] == 1 else ged


if __name__ == "__main__":
    # Module hyper-params (deterministic, in-script)
    mu_min, mu_max, step = 0.0, 5.0, 0.5          # -> n_mu = 11

    key = jax.random.PRNGKey(0)
    k1, k2, k3 = jax.random.split(key, 3)

    # Case 1: batch of distance vectors, (B, N) with B > 1 (no squeeze), M % 128 == 0.
    r1 = jax.random.uniform(k1, (2, 256), jnp.float32, 0.0, 6.0)
    out1 = jax.block_until_ready(gaussian_expansion(r1, mu_min, mu_max, step))
    ref1 = _reference(r1, mu_min, mu_max, step)
    assert out1.shape == ref1.shape == (2, 256, 11), (out1.shape, ref1.shape)
    assert out1.dtype == jnp.float32
    assert jnp.allclose(out1, ref1, atol=1e-5, rtol=1e-5), "case 1 mismatch vs reference"

    # Case 2: B == 1, ragged N (exercises squeeze(0) + lane padding / tail slice).
    r2 = jax.random.uniform(k2, (1, 200), jnp.float32, 0.0, 6.0)
    out2 = jax.block_until_ready(gaussian_expansion(r2, mu_min, mu_max, step))
    ref2 = _reference(r2, mu_min, mu_max, step)
    assert out2.shape == ref2.shape == (200, 11), (out2.shape, ref2.shape)
    assert jnp.allclose(out2, ref2, atol=1e-5, rtol=1e-5), "case 2 mismatch vs reference"

    # Case 3: 1-D distances (torch broadcast adds then squeezes the leading axis).
    r3 = jax.random.uniform(k3, (72,), jnp.float32, 0.0, 6.0)
    out3 = jax.block_until_ready(gaussian_expansion(r3, mu_min, mu_max, step))
    ref3 = _reference(r3, mu_min, mu_max, step)
    assert out3.shape == ref3.shape == (72, 11), (out3.shape, ref3.shape)
    assert jnp.allclose(out3, ref3, atol=1e-5, rtol=1e-5), "case 3 mismatch vs reference"

    print("KERNEL_OK")
</pallas_src>

<mosaic_0001>
module attributes {stable_mosaic.version = 11 : i64} {
  func.func @_gauss_expand_kernel(%arg0: i32, %arg1: memref<1x512xf32, #tpu.memory_space<vmem>>, %arg2: memref<512x11xf32, #tpu.memory_space<vmem>>) attributes {dimension_semantics = [#tpu.dimension_semantics<parallel>], iteration_bounds = array<i64: 1>, scalar_prefetch = 0 : i64, scratch_operands = 0 : i64, tpu.core_type = #tpu.core_type<tc>, window_params = [{transform_indices = @transform_0, window_bounds = array<i64: 1, 512>}, {transform_indices = @transform_1, window_bounds = array<i64: 512, 11>}]} {
    %c0 = arith.constant 0 : index
    %c0_0 = arith.constant 0 : index
    %0 = vector.load %arg1[%c0, %c0_0] : memref<1x512xf32, #tpu.memory_space<vmem>>, vector<1x512xf32>
    %1 = tpu.iota {dimensions = array<i32: 0>} : vector<16x512xi32>
    %2 = arith.sitofp %1 : vector<16x512xi32> to vector<16x512xf32>
    %cst = arith.constant 5.000000e-01 : f32
    %3 = vector.broadcast %cst : f32 to vector<16x512xf32>
    %4 = arith.mulf %2, %3 : vector<16x512xf32>
    %cst_1 = arith.constant 0.000000e+00 : f32
    %5 = vector.broadcast %cst_1 : f32 to vector<16x512xf32>
    %6 = arith.addf %5, %4 : vector<16x512xf32>
    %7 = vector.broadcast %0 : vector<1x512xf32> to vector<16x512xf32>
    %8 = arith.subf %7, %6 : vector<16x512xf32>
    %cst_2 = arith.constant -2.000000e+00 : f32
    %9 = vector.broadcast %cst_2 : f32 to vector<16x512xf32>
    %10 = arith.mulf %9, %8 : vector<16x512xf32>
    %11 = arith.mulf %10, %8 : vector<16x512xf32>
    %12 = math.exp %11 : vector<16x512xf32>
    %13 = tpu.transpose %12, [1, 0] : vector<16x512xf32> -> vector<512x16xf32>
    %14 = vector.extract_strided_slice %13 {offsets = [0, 0], sizes = [512, 11], strides = [1, 1]} : vector<512x16xf32> to vector<512x11xf32>
    %c0_3 = arith.constant 0 : index
    %c0_4 = arith.constant 0 : index
    %15 = vector.load %arg2[%c0_3, %c0_4] : memref<512x11xf32, #tpu.memory_space<vmem>>, vector<512x11xf32>
    tpu.vector_store %arg2[%c0_3, %c0_4], %14 {strides = array<i32>} : memref<512x11xf32, #tpu.memory_space<vmem>>, vector<512x11xf32>,
    return
  }
  func.func @transform_0(%arg0: i32) -> (i32, i32) {
    %c0_i32 = arith.constant 0 : i32
    %c0_i32_0 = arith.constant 0 : i32
    return %c0_i32, %arg0 : i32, i32
  }
  func.func @transform_1(%arg0: i32) -> (i32, i32) {
    %c0_i32 = arith.constant 0 : i32
    %c0_i32_0 = arith.constant 0 : i32
    return %arg0, %c0_i32 : i32, i32
  }
}

</mosaic_0001>

<bundles_post_ra>
// kernel: tpu_custom_call.1
= control target key start
LH: loop header
LB: loop body
LE: loop exit
PB: predicated region body
PF: predicated region fallthrough
CT: control target
= control target key end

     0   :  { %6 = vsyncpa [#allocation3], 0  ;;  %s331_s6 = smov [#allocation2]   ;;  %s610_s0 = inlined_call_operand.hbm [shape: f32[1,512], index: 0, kind: input, shape index: {}]   ;;  %s611_s1 = inlined_call_operand.vmem [shape: f32[512,11], index: 1, kind: output, shape index: {}]  }
   0x1   :  { %s13_s7 = sshll.u32 %s331_s6, 4  ;;  %s307_s10 = scalar_lea.hbm %s610_s0, 64  ;;  %s14_s7 = int_to_ptr.vmem [resolvable:$true] %s13_s7 }
   0x2   :  { %p308_p0 = scmp.ne.s32.totalorder %s610_s0, %s307_s10  ;;  %p311_p1 = scmp.lt.u32.totalorder %s307_s10, %s610_s0 }
   0x4   :  { %p313_p2 = pnand %p311_p1, %p308_p0 }
   0x6   :  { %316 = shalt.err (!%p313_p2)
}
   0x7   :  { %s317_s15 = scalar_lea.vmem %s14_s7, 64  ;;  %p322_p4 = scmp.lt.s32.totalorder %s14_s7, %s14_s7 }
   0x8   :  { %p318_p3 = scmp.ne.s32.totalorder %s14_s7, %s317_s15  ;;  %p323_p5 = scmp.lt.s32.totalorder %s317_s15, %s317_s15 }
   0xa   :  { %p324_p6 = por %p323_p5, %p322_p4 }
   0xc   :  { %p325_p7 = pnand %p324_p6, %p318_p3 }
   0xe   :  { %328 = shalt.err (!%p325_p7)
}
   0xf   :  { %16 = dma.hbm_to_vmem [thread:$0]  %s610_s0, 64, %s14_s7, [#allocation3]  }
  0x10   :  { %329 = dma.done.wait [#allocation3], 64  }
  0x11   :  { %330 = vsyncadd [#allocation3], 4294967232  ;;  %v21_v0 = vlaneseq  ;;  %v20_v9 = vld [vmem:[#allocation2] sm:$0xf]  ;;  %vm219_vm0 = vcmask 89088  }
  0x13   :  { %v22_v1 = vshrl.u32 %v21_v0, 7 }
  0x15   :  { %v23_v2 = vadd.s32 8, %v22_v1  ;;  %v24_v3 = vcvt.s32.f32 %v22_v1  ;;  %v37_v4 = vsub.s32 1, %v22_v1  ;;  %v41_v5 = vsub.s32 2, %v22_v1 }
  0x16   :  { %v33_v6 = vsub.s32 0, %v22_v1  ;;  %v45_v36 = vsub.s32 3, %v22_v1 }
  0x17   :  { %v25_v7 = vcvt.s32.f32 %v23_v2  ;;  %v26_v8 = vmul.f32 0.5, %v24_v3  ;;  %v38_v11 = vrot.slane %v20_v9, %v37_v4  ;;  %v42_v12 = vrot.slane %v20_v9, %v41_v5 }
  0x18   :  { %v34_v13 = vrot.slane %v20_v9, %v33_v6  ;;  %v46_v37 = vrot.slane %v20_v9, %v45_v36 }
  0x19   :  { %v27_v10 = vmul.f32 0.5, %v25_v7  ;;  %v52_v14 = vsub.f32 %v38_v11, %v26_v8  ;;  %v53_v19 = vsub.f32 %v42_v12, %v26_v8 }
  0x1a   :  { %v51_v17 = vsub.f32 %v34_v13, %v26_v8  ;;  %v54_v38 = vsub.f32 %v46_v37, %v26_v8 }
  0x1b   :  { %v56_v15 = vsub.f32 %v38_v11, %v27_v10  ;;  %v57_v16 = vsub.f32 %v42_v12, %v27_v10  ;;  %v55_v18 = vsub.f32 %v34_v13, %v27_v10  ;;  %v60_v20 = vmul.f32 -2.0, %v52_v14 }
  0x1c   :  { %v59_v22 = vmul.f32 -2.0, %v51_v17  ;;  %v58_v39 = vsub.f32 %v46_v37, %v27_v10  ;;  %v62_v40 = vmul.f32 -2.0, %v54_v38  ;;  %v61_v41 = vmul.f32 -2.0, %v53_v19 }
  0x1d   :  { %v64_v21 = vmul.f32 -2.0, %v56_v15  ;;  %v63_v23 = vmul.f32 -2.0, %v55_v18  ;;  %v68_v24 = vmul.f32 %v60_v20, %v52_v14  ;;  %v65_v44 = vmul.f32 -2.0, %v57_v16 }
  0x1e   :  { %v67_v26 = vmul.f32 %v59_v22, %v51_v17  ;;  %v66_v42 = vmul.f32 -2.0, %v58_v39  ;;  %v70_v43 = vmul.f32 %v62_v40, %v54_v38  ;;  %v69_v45 = vmul.f32 %v61_v41, %v53_v19 }
  0x1f   :  { %v72_v25 = vmul.f32 %v64_v21, %v56_v15  ;;  %v71_v27 = vmul.f32 %v63_v23, %v55_v18  ;;  %v77_v28 = vmul.f32 1.442695, %v68_v24  ;;  %v73_v48 = vmul.f32 %v65_v44, %v57_v16 }
  0x20   :  { %v75_v29 = vmul.f32 1.442695, %v67_v26  ;;  %v74_v46 = vmul.f32 %v66_v42, %v58_v39  ;;  %v81_v47 = vmul.f32 1.442695, %v70_v43  ;;  %v79_v49 = vmul.f32 1.442695, %v69_v45 }
  0x21   :  { %291 = vpow2.f32 %v77_v28  ;;  %v85_v30 = vmul.f32 1.442695, %v72_v25  ;;  %v83_v31 = vmul.f32 1.442695, %v71_v27  ;;  %v87_v51 = vmul.f32 1.442695, %v73_v48 }
  0x22   :  { %293 = vpow2.f32 %v75_v29  ;;  %v89_v50 = vmul.f32 1.442695, %v74_v46 }
  0x23   :  { %295 = vpow2.f32 %v85_v30 }
  0x24   :  { %297 = vpow2.f32 %v83_v31 }
  0x25   :  { %299 = vpow2.f32 %v81_v47 }
  0x26   :  { %301 = vpow2.f32 %v79_v49 }
  0x27   :  { %303 = vpow2.f32 %v89_v50 }
  0x28   :  { %305 = vpow2.f32 %v87_v51 }
  0x2b   :  { %v292_v32 = vpop.eup %291 }
  0x2c   :  { %123 = vxpose.xlu1.b32.start [1/2] (short) %v292_v32, 128  ;;  %v294_v33 = vpop.eup %293 }
  0x2d   :  { %v296_v34 = vpop.eup %295  ;;  %91 = vxpose.xlu0.b32.start [1/2] (short) %v294_v33, 128 }
  0x2e   :  { %v298_v35 = vpop.eup %297 }
  0x2f   :  { %v300_v52 = vpop.eup %299 }
  0x30   :  { %124 = vxpose.xlu1.b32.end [2/2] (short) %v296_v34, 128  ;;  %v302_v53 = vpop.eup %301 }
  0x31   :  { %92 = vxpose.xlu0.b32.end [2/2] (short) %v298_v35, 128  ;;  %v304_v54 = vpop.eup %303 }
  0x32   :  { %v306_v55 = vpop.eup %305 }
  0x69   :  { %187 = vxpose.xlu1.b32.start [1/2] (short) %v300_v52, 128 }
  0x6a   :  { %155 = vxpose.xlu0.b32.start [1/2] (short) %v302_v53, 128 }
  0x6d   :  { %188 = vxpose.xlu1.b32.end [2/2] (short) %v304_v54, 128 }
  0x6e   :  { %156 = vxpose.xlu0.b32.end [2/2] (short) %v306_v55, 128 }
  0xac   :  { %v139_v56 = vpop.trf.xlu1 }
  0xad   :  { %236 = vst.msk [vmem:[%s611_s1 + $0x80] sm:$0xff] %vm219_vm0, %v139_v56  ;;  %v107_v57 = vpop.trf.xlu0 }
  0xae   :  { %220 = vst.msk [vmem:[%s611_s1] sm:$0xff] %vm219_vm0, %v107_v57 }
  0xb0   :  { %v140_v58 = vpop.trf.xlu1 }
  0xb1   :  { %237 = vst.msk [vmem:[%s611_s1 + $0x88] sm:$0xff] %vm219_vm0, %v140_v58  ;;  %v108_v59 = vpop.trf.xlu0 }
  0xb2   :  { %221 = vst.msk [vmem:[%s611_s1 + $0x8] sm:$0xff] %vm219_vm0, %v108_v59 }
  0xb4   :  { %v141_v60 = vpop.trf.xlu1 }
  0xb5   :  { %238 = vst.msk [vmem:[%s611_s1 + $0x90] sm:$0xff] %vm219_vm0, %v141_v60  ;;  %v109_v61 = vpop.trf.xlu0 }
  0xb6   :  { %222 = vst.msk [vmem:[%s611_s1 + $0x10] sm:$0xff] %vm219_vm0, %v109_v61 }
  0xb8   :  { %v142_v62 = vpop.trf.xlu1 }
  0xb9   :  { %239 = vst.msk [vmem:[%s611_s1 + $0x98] sm:$0xff] %vm219_vm0, %v142_v62  ;;  %v110_v63 = vpop.trf.xlu0 }
  0xba   :  { %223 = vst.msk [vmem:[%s611_s1 + $0x18] sm:$0xff] %vm219_vm0, %v110_v63 }
  0xbc   :  { %v143_v0 = vpop.trf.xlu1 }
  0xbd   :  { %240 = vst.msk [vmem:[%s611_s1 + $0xa0] sm:$0xff] %vm219_vm0, %v143_v0  ;;  %v111_v1 = vpop.trf.xlu0 }
  0xbe   :  { %224 = vst.msk [vmem:[%s611_s1 + $0x20] sm:$0xff] %vm219_vm0, %v111_v1 }
  0xc0   :  { %v144_v2 = vpop.trf.xlu1 }
  0xc1   :  { %241 = vst.msk [vmem:[%s611_s1 + $0xa8] sm:$0xff] %vm219_vm0, %v144_v2  ;;  %v112_v3 = vpop.trf.xlu0 }
  0xc2   :  { %225 = vst.msk [vmem:[%s611_s1 + $0x28] sm:$0xff] %vm219_vm0, %v112_v3 }
  0xc4   :  { %v145_v4 = vpop.trf.xlu1 }
  0xc5   :  { %242 = vst.msk [vmem:[%s611_s1 + $0xb0] sm:$0xff] %vm219_vm0, %v145_v4  ;;  %v113_v5 = vpop.trf.xlu0 }
  0xc6   :  { %226 = vst.msk [vmem:[%s611_s1 + $0x30] sm:$0xff] %vm219_vm0, %v113_v5 }
  0xc8   :  { %v146_v6 = vpop.trf.xlu1 }
  0xc9   :  { %243 = vst.msk [vmem:[%s611_s1 + $0xb8] sm:$0xff] %vm219_vm0, %v146_v6  ;;  %v114_v7 = vpop.trf.xlu0 }
  0xca   :  { %227 = vst.msk [vmem:[%s611_s1 + $0x38] sm:$0xff] %vm219_vm0, %v114_v7 }
  0xcc   :  { %v147_v8 = vpop.trf.xlu1 }
  0xcd   :  { %244 = vst.msk [vmem:[%s611_s1 + $0xc0] sm:$0xff] %vm219_vm0, %v147_v8  ;;  %v115_v9 = vpop.trf.xlu0 }
  0xce   :  { %228 = vst.msk [vmem:[%s611_s1 + $0x40] sm:$0xff] %vm219_vm0, %v115_v9 }
  0xd0   :  { %v148_v10 = vpop.trf.xlu1 }
  0xd1   :  { %245 = vst.msk [vmem:[%s611_s1 + $0xc8] sm:$0xff] %vm219_vm0, %v148_v10  ;;  %v116_v11 = vpop.trf.xlu0 }
  0xd2   :  { %229 = vst.msk [vmem:[%s611_s1 + $0x48] sm:$0xff] %vm219_vm0, %v116_v11 }
  0xd4   :  { %v149_v12 = vpop.trf.xlu1 }
  0xd5   :  { %246 = vst.msk [vmem:[%s611_s1 + $0xd0] sm:$0xff] %vm219_vm0, %v149_v12  ;;  %v117_v13 = vpop.trf.xlu0 }
  0xd6   :  { %230 = vst.msk [vmem:[%s611_s1 + $0x50] sm:$0xff] %vm219_vm0, %v117_v13 }
  0xd8   :  { %v150_v14 = vpop.trf.xlu1 }
  0xd9   :  { %247 = vst.msk [vmem:[%s611_s1 + $0xd8] sm:$0xff] %vm219_vm0, %v150_v14  ;;  %v118_v15 = vpop.trf.xlu0 }
  0xda   :  { %231 = vst.msk [vmem:[%s611_s1 + $0x58] sm:$0xff] %vm219_vm0, %v118_v15 }
  0xdc   :  { %v151_v16 = vpop.trf.xlu1 }
  0xdd   :  { %248 = vst.msk [vmem:[%s611_s1 + $0xe0] sm:$0xff] %vm219_vm0, %v151_v16  ;;  %v119_v17 = vpop.trf.xlu0 }
  0xde   :  { %232 = vst.msk [vmem:[%s611_s1 + $0x60] sm:$0xff] %vm219_vm0, %v119_v17 }
  0xe0   :  { %v152_v18 = vpop.trf.xlu1 }
  0xe1   :  { %249 = vst.msk [vmem:[%s611_s1 + $0xe8] sm:$0xff] %vm219_vm0, %v152_v18  ;;  %v120_v19 = vpop.trf.xlu0 }
  0xe2   :  { %233 = vst.msk [vmem:[%s611_s1 + $0x68] sm:$0xff] %vm219_vm0, %v120_v19 }
  0xe4   :  { %v153_v20 = vpop.trf.xlu1 }
  0xe5   :  { %250 = vst.msk [vmem:[%s611_s1 + $0xf0] sm:$0xff] %vm219_vm0, %v153_v20  ;;  %v121_v21 = vpop.trf.xlu0 }
  0xe6   :  { %234 = vst.msk [vmem:[%s611_s1 + $0x70] sm:$0xff] %vm219_vm0, %v121_v21 }
  0xe8   :  { %v154_v22 = vpop.trf.xlu1 }
  0xe9   :  { %251 = vst.msk [vmem:[%s611_s1 + $0xf8] sm:$0xff] %vm219_vm0, %v154_v22  ;;  %v122_v23 = vpop.trf.xlu0 }
  0xea   :  { %235 = vst.msk [vmem:[%s611_s1 + $0x78] sm:$0xff] %vm219_vm0, %v122_v23 }
  0xec   :  { %v203_v24 = vpop.trf.xlu1 }
  0xed   :  { %268 = vst.msk [vmem:[%s611_s1 + $0x180] sm:$0xff] %vm219_vm0, %v203_v24  ;;  %v171_v25 = vpop.trf.xlu0 }
  0xee   :  { %252 = vst.msk [vmem:[%s611_s1 + $0x100] sm:$0xff] %vm219_vm0, %v171_v25 }
  0xf0   :  { %v204_v26 = vpop.trf.xlu1 }
  0xf1   :  { %269 = vst.msk [vmem:[%s611_s1 + $0x188] sm:$0xff] %vm219_vm0, %v204_v26  ;;  %v172_v27 = vpop.trf.xlu0 }
  0xf2   :  { %253 = vst.msk [vmem:[%s611_s1 + $0x108] sm:$0xff] %vm219_vm0, %v172_v27 }
  0xf4   :  { %v205_v28 = vpop.trf.xlu1 }
  0xf5   :  { %270 = vst.msk [vmem:[%s611_s1 + $0x190] sm:$0xff] %vm219_vm0, %v205_v28  ;;  %v173_v29 = vpop.trf.xlu0 }
  0xf6   :  { %254 = vst.msk [vmem:[%s611_s1 + $0x110] sm:$0xff] %vm219_vm0, %v173_v29 }
  0xf8   :  { %v206_v30 = vpop.trf.xlu1 }
  0xf9   :  { %271 = vst.msk [vmem:[%s611_s1 + $0x198] sm:$0xff] %vm219_vm0, %v206_v30  ;;  %v174_v31 = vpop.trf.xlu0 }
  0xfa   :  { %255 = vst.msk [vmem:[%s611_s1 + $0x118] sm:$0xff] %vm219_vm0, %v174_v31 }
  0xfc   :  { %v207_v32 = vpop.trf.xlu1 }
  0xfd   :  { %272 = vst.msk [vmem:[%s611_s1 + $0x1a0] sm:$0xff] %vm219_vm0, %v207_v32  ;;  %v175_v33 = vpop.trf.xlu0 }
  0xfe   :  { %256 = vst.msk [vmem:[%s611_s1 + $0x120] sm:$0xff] %vm219_vm0, %v175_v33 }
 0x100   :  { %v208_v34 = vpop.trf.xlu1 }
 0x101   :  { %273 = vst.msk [vmem:[%s611_s1 + $0x1a8] sm:$0xff] %vm219_vm0, %v208_v34  ;;  %v176_v35 = vpop.trf.xlu0 }
 0x102   :  { %257 = vst.msk [vmem:[%s611_s1 + $0x128] sm:$0xff] %vm219_vm0, %v176_v35 }
 0x104   :  { %v209_v36 = vpop.trf.xlu1 }
 0x105   :  { %274 = vst.msk [vmem:[%s611_s1 + $0x1b0] sm:$0xff] %vm219_vm0, %v209_v36  ;;  %v177_v37 = vpop.trf.xlu0 }
 0x106   :  { %258 = vst.msk [vmem:[%s611_s1 + $0x130] sm:$0xff] %vm219_vm0, %v177_v37 }
 0x108   :  { %v210_v38 = vpop.trf.xlu1 }
 0x109   :  { %275 = vst.msk [vmem:[%s611_s1 + $0x1b8] sm:$0xff] %vm219_vm0, %v210_v38  ;;  %v178_v39 = vpop.trf.xlu0 }
 0x10a   :  { %259 = vst.msk [vmem:[%s611_s1 + $0x138] sm:$0xff] %vm219_vm0, %v178_v39 }
 0x10c   :  { %v211_v40 = vpop.trf.xlu1 }
 0x10d   :  { %276 = vst.msk [vmem:[%s611_s1 + $0x1c0] sm:$0xff] %vm219_vm0, %v211_v40  ;;  %v179_v41 = vpop.trf.xlu0 }
 0x10e   :  { %260 = vst.msk [vmem:[%s611_s1 + $0x140] sm:$0xff] %vm219_vm0, %v179_v41 }
 0x110   :  { %v212_v42 = vpop.trf.xlu1 }
 0x111   :  { %277 = vst.msk [vmem:[%s611_s1 + $0x1c8] sm:$0xff] %vm219_vm0, %v212_v42  ;;  %v180_v43 = vpop.trf.xlu0 }
 0x112   :  { %261 = vst.msk [vmem:[%s611_s1 + $0x148] sm:$0xff] %vm219_vm0, %v180_v43 }
 0x114   :  { %v213_v44 = vpop.trf.xlu1 }
 0x115   :  { %278 = vst.msk [vmem:[%s611_s1 + $0x1d0] sm:$0xff] %vm219_vm0, %v213_v44  ;;  %v181_v45 = vpop.trf.xlu0 }
 0x116   :  { %262 = vst.msk [vmem:[%s611_s1 + $0x150] sm:$0xff] %vm219_vm0, %v181_v45 }
 0x118   :  { %v214_v46 = vpop.trf.xlu1 }
 0x119   :  { %279 = vst.msk [vmem:[%s611_s1 + $0x1d8] sm:$0xff] %vm219_vm0, %v214_v46  ;;  %v182_v47 = vpop.trf.xlu0 }
 0x11a   :  { %263 = vst.msk [vmem:[%s611_s1 + $0x158] sm:$0xff] %vm219_vm0, %v182_v47 }
 0x11c   :  { %v215_v48 = vpop.trf.xlu1 }
 0x11d   :  { %280 = vst.msk [vmem:[%s611_s1 + $0x1e0] sm:$0xff] %vm219_vm0, %v215_v48  ;;  %v183_v49 = vpop.trf.xlu0 }
 0x11e   :  { %264 = vst.msk [vmem:[%s611_s1 + $0x160] sm:$0xff] %vm219_vm0, %v183_v49 }
 0x120   :  { %v216_v50 = vpop.trf.xlu1 }
 0x121   :  { %281 = vst.msk [vmem:[%s611_s1 + $0x1e8] sm:$0xff] %vm219_vm0, %v216_v50  ;;  %v184_v51 = vpop.trf.xlu0 }
 0x122   :  { %265 = vst.msk [vmem:[%s611_s1 + $0x168] sm:$0xff] %vm219_vm0, %v184_v51 }
 0x124   :  { %v217_v52 = vpop.trf.xlu1 }
 0x125   :  { %282 = vst.msk [vmem:[%s611_s1 + $0x1f0] sm:$0xff] %vm219_vm0, %v217_v52  ;;  %v185_v53 = vpop.trf.xlu0 }
 0x126   :  { %266 = vst.msk [vmem:[%s611_s1 + $0x170] sm:$0xff] %vm219_vm0, %v185_v53 }
 0x128   :  { %v218_v54 = vpop.trf.xlu1 }
 0x129   :  { %283 = vst.msk [vmem:[%s611_s1 + $0x1f8] sm:$0xff] %vm219_vm0, %v218_v54  ;;  %v186_v55 = vpop.trf.xlu0 }
 0x12a   :  { %267 = vst.msk [vmem:[%s611_s1 + $0x178] sm:$0xff] %vm219_vm0, %v186_v55 }
 0x12b   :  { %288 = vsyncpa [#allocation3], 1 }

</bundles_post_ra>
